<compile_context>
chip_gen: v7x
topology: tpu7x:2x2x1
jax: 0.10.0
libtpu: 0.0.40
codegen_flags: <defaults>
</compile_context>

<pallas_src>
import jax
import jax.numpy as jnp
from jax.experimental import pallas as pl
from jax.experimental.pallas import tpu as pltpu

IN_DIM = 2
HID = 64
OUT_DIM = 60
OUT_PAD = 128  # lane-dense output width (multiple of 128)


def _mlp_kernel(y_ref, w1_ref, b1_ref, w2_ref, b2_ref, w3_ref, b3_ref, o_ref):
    y = y_ref[...]  # (TB, 2) f32

    # linear1 + relu: K=2 contraction done on the VPU as an outer product
    # (avoids an MXU pass whose contraction dim would be ~98% zero padding).
    h = y[:, 0:1] * w1_ref[0:1, :] + y[:, 1:2] * w1_ref[1:2, :] + b1_ref[...]
    h = jnp.maximum(h, 0.0)

    # linear2 + relu (64x64, MXU)
    h = jnp.dot(h, w2_ref[...], preferred_element_type=jnp.float32) + b2_ref[...]
    h = jnp.maximum(h, 0.0)

    # linear2 again (same weights, as in the PyTorch forward) + relu
    h = jnp.dot(h, w2_ref[...], preferred_element_type=jnp.float32) + b2_ref[...]
    h = jnp.maximum(h, 0.0)

    # linear3 (no activation), output padded to 128 lanes -> unmasked stores
    out = jnp.dot(h, w3_ref[...], preferred_element_type=jnp.float32) + b3_ref[...]
    o_ref[...] = out.astype(o_ref.dtype)


def _round_up(x, m):
    return ((x + m - 1) // m) * m


def netR_forward(y, params, *, tb=256):
    """y: (B, 2) float32. params: dict of w1,b1,w2,b2,w3,b3 (weights stored as
    (in, out), biases as (1, out))."""
    w1, b1 = params["w1"], params["b1"]
    w2, b2 = params["w2"], params["b2"]
    w3, b3 = params["w3"], params["b3"]

    B = y.shape[0]

    # Pad linear3 to a lane-dense (multiple-of-128) output width.
    w3p = jnp.zeros((HID, OUT_PAD), jnp.float32).at[:, :OUT_DIM].set(w3)
    b3p = jnp.zeros((1, OUT_PAD), jnp.float32).at[:, :OUT_DIM].set(b3)

    # Batch tile: large enough to amortize per-step overhead, shrunk for tiny B.
    tb = min(tb, _round_up(B, 8))
    b_pad = _round_up(B, tb)
    if b_pad != B:
        y = jnp.pad(y, ((0, b_pad - B), (0, 0)))

    # Weights/biases: one full block, constant block index -> stay resident in
    # VMEM across the whole batch grid (only activations are re-DMA'd).
    def full(a):
        return pl.BlockSpec(a.shape, lambda i: tuple(0 for _ in a.shape))

    out = pl.pallas_call(
        _mlp_kernel,
        out_shape=jax.ShapeDtypeStruct((b_pad, OUT_PAD), jnp.float32),
        grid=(b_pad // tb,),
        in_specs=[
            pl.BlockSpec((tb, IN_DIM), lambda i: (i, 0)),  # streamed activations
            full(w1), full(b1), full(w2), full(b2), full(w3p), full(b3p),
        ],
        out_specs=pl.BlockSpec((tb, OUT_PAD), lambda i: (i, 0)),
        compiler_params=pltpu.CompilerParams(
            dimension_semantics=("parallel",)),
    )(y, w1, b1, w2, b2, w3p, b3p)

    return out[:B, :OUT_DIM]


def init_params(key):
    """Deterministic init mimicking PyTorch's default Linear init
    (uniform(-1/sqrt(fan_in), 1/sqrt(fan_in)))."""
    def linear(key, fan_in, fan_out):
        kw, kb = jax.random.split(key)
        bound = 1.0 / jnp.sqrt(jnp.float32(fan_in))
        # stored as (in, out) so the kernel computes x @ W
        w = jax.random.uniform(kw, (fan_in, fan_out), jnp.float32, -bound, bound)
        b = jax.random.uniform(kb, (1, fan_out), jnp.float32, -bound, bound)
        return w, b

    k1, k2, k3 = jax.random.split(key, 3)
    w1, b1 = linear(k1, IN_DIM, HID)
    w2, b2 = linear(k2, HID, HID)
    w3, b3 = linear(k3, HID, OUT_DIM)
    return {"w1": w1, "b1": b1, "w2": w2, "b2": b2, "w3": w3, "b3": b3}


def netR_reference(y, p):
    h = jnp.maximum(y @ p["w1"] + p["b1"], 0.0)
    h = jnp.maximum(h @ p["w2"] + p["b2"], 0.0)
    h = jnp.maximum(h @ p["w2"] + p["b2"], 0.0)
    return h @ p["w3"] + p["b3"]


if __name__ == "__main__":
    key = jax.random.PRNGKey(0)
    k_params, k_input = jax.random.split(key)

    params = init_params(k_params)
    # Non-multiple-of-tile batch to exercise the grid + padding path while
    # staying small.
    B = 300
    y = jax.random.normal(k_input, (B, IN_DIM), dtype=jnp.float32)

    out = netR_forward(y, params)
    out = jax.block_until_ready(out)

    ref = netR_reference(y, params)
    assert out.shape == (B, OUT_DIM), out.shape
    assert jnp.allclose(out, ref, atol=1e-5, rtol=1e-5), "mismatch vs reference"

    print("KERNEL_OK")
</pallas_src>

<mosaic_0001>
module attributes {stable_mosaic.version = 11 : i64} {
  func.func @_mlp_kernel(%arg0: i32, %arg1: memref<256x2xf32, #tpu.memory_space<vmem>>, %arg2: memref<2x64xf32, #tpu.memory_space<vmem>>, %arg3: memref<1x64xf32, #tpu.memory_space<vmem>>, %arg4: memref<64x64xf32, #tpu.memory_space<vmem>>, %arg5: memref<1x64xf32, #tpu.memory_space<vmem>>, %arg6: memref<64x128xf32, #tpu.memory_space<vmem>>, %arg7: memref<1x128xf32, #tpu.memory_space<vmem>>, %arg8: memref<256x128xf32, #tpu.memory_space<vmem>>) attributes {dimension_semantics = [#tpu.dimension_semantics<parallel>], iteration_bounds = array<i64: 2>, scalar_prefetch = 0 : i64, scratch_operands = 0 : i64, tpu.core_type = #tpu.core_type<tc>, window_params = [{transform_indices = @transform_0, window_bounds = array<i64: 256, 2>}, {pipeline_mode = #tpu.pipeline_mode<synchronous>, transform_indices = @transform_1, window_bounds = array<i64: 2, 64>}, {pipeline_mode = #tpu.pipeline_mode<synchronous>, transform_indices = @transform_2, window_bounds = array<i64: 1, 64>}, {pipeline_mode = #tpu.pipeline_mode<synchronous>, transform_indices = @transform_3, window_bounds = array<i64: 64, 64>}, {pipeline_mode = #tpu.pipeline_mode<synchronous>, transform_indices = @transform_4, window_bounds = array<i64: 1, 64>}, {pipeline_mode = #tpu.pipeline_mode<synchronous>, transform_indices = @transform_5, window_bounds = array<i64: 64, 128>}, {pipeline_mode = #tpu.pipeline_mode<synchronous>, transform_indices = @transform_6, window_bounds = array<i64: 1, 128>}, {transform_indices = @transform_7, window_bounds = array<i64: 256, 128>}]} {
    %c0 = arith.constant 0 : index
    %c0_0 = arith.constant 0 : index
    %0 = vector.load %arg1[%c0, %c0_0] : memref<256x2xf32, #tpu.memory_space<vmem>>, vector<256x2xf32>
    %1 = vector.extract_strided_slice %0 {offsets = [0, 0], sizes = [256, 1], strides = [1, 1]} : vector<256x2xf32> to vector<256x1xf32>
    %c0_1 = arith.constant 0 : index
    %c0_2 = arith.constant 0 : index
    %2 = vector.load %arg2[%c0_1, %c0_2] : memref<2x64xf32, #tpu.memory_space<vmem>>, vector<1x64xf32>
    %3 = vector.broadcast %1 : vector<256x1xf32> to vector<256x64xf32>
    %4 = vector.broadcast %2 : vector<1x64xf32> to vector<256x64xf32>
    %5 = arith.mulf %3, %4 : vector<256x64xf32>
    %6 = vector.extract_strided_slice %0 {offsets = [0, 1], sizes = [256, 1], strides = [1, 1]} : vector<256x2xf32> to vector<256x1xf32>
    %c1 = arith.constant 1 : index
    %c0_3 = arith.constant 0 : index
    %7 = vector.load %arg2[%c1, %c0_3] : memref<2x64xf32, #tpu.memory_space<vmem>>, vector<1x64xf32>
    %8 = vector.broadcast %6 : vector<256x1xf32> to vector<256x64xf32>
    %9 = vector.broadcast %7 : vector<1x64xf32> to vector<256x64xf32>
    %10 = arith.mulf %8, %9 : vector<256x64xf32>
    %11 = arith.addf %5, %10 : vector<256x64xf32>
    %c0_4 = arith.constant 0 : index
    %c0_5 = arith.constant 0 : index
    %12 = vector.load %arg3[%c0_4, %c0_5] : memref<1x64xf32, #tpu.memory_space<vmem>>, vector<1x64xf32>
    %13 = vector.broadcast %12 : vector<1x64xf32> to vector<256x64xf32>
    %14 = arith.addf %11, %13 : vector<256x64xf32>
    %cst = arith.constant 0.000000e+00 : f32
    %15 = vector.broadcast %cst : f32 to vector<256x64xf32>
    %16 = arith.maximumf %14, %15 : vector<256x64xf32>
    %c0_6 = arith.constant 0 : index
    %c0_7 = arith.constant 0 : index
    %17 = vector.load %arg4[%c0_6, %c0_7] : memref<64x64xf32, #tpu.memory_space<vmem>>, vector<64x64xf32>
    %cst_8 = arith.constant dense<0.000000e+00> : vector<256x64xf32>
    %18 = tpu.matmul %16, %17, %cst_8 {dimension_numbers = #tpu.dot_dimension_numbers<[1], [0], [0], [1], [0, 0, 1, 1], [], []>} : vector<256x64xf32>, vector<64x64xf32>, vector<256x64xf32> -> vector<256x64xf32>
    %c0_9 = arith.constant 0 : index
    %c0_10 = arith.constant 0 : index
    %19 = vector.load %arg5[%c0_9, %c0_10] : memref<1x64xf32, #tpu.memory_space<vmem>>, vector<1x64xf32>
    %20 = vector.broadcast %19 : vector<1x64xf32> to vector<256x64xf32>
    %21 = arith.addf %18, %20 : vector<256x64xf32>
    %cst_11 = arith.constant 0.000000e+00 : f32
    %22 = vector.broadcast %cst_11 : f32 to vector<256x64xf32>
    %23 = arith.maximumf %21, %22 : vector<256x64xf32>
    %c0_12 = arith.constant 0 : index
    %c0_13 = arith.constant 0 : index
    %24 = vector.load %arg4[%c0_12, %c0_13] : memref<64x64xf32, #tpu.memory_space<vmem>>, vector<64x64xf32>
    %cst_14 = arith.constant dense<0.000000e+00> : vector<256x64xf32>
    %25 = tpu.matmul %23, %24, %cst_14 {dimension_numbers = #tpu.dot_dimension_numbers<[1], [0], [0], [1], [0, 0, 1, 1], [], []>} : vector<256x64xf32>, vector<64x64xf32>, vector<256x64xf32> -> vector<256x64xf32>
    %c0_15 = arith.constant 0 : index
    %c0_16 = arith.constant 0 : index
    %26 = vector.load %arg5[%c0_15, %c0_16] : memref<1x64xf32, #tpu.memory_space<vmem>>, vector<1x64xf32>
    %27 = vector.broadcast %26 : vector<1x64xf32> to vector<256x64xf32>
    %28 = arith.addf %25, %27 : vector<256x64xf32>
    %cst_17 = arith.constant 0.000000e+00 : f32
    %29 = vector.broadcast %cst_17 : f32 to vector<256x64xf32>
    %30 = arith.maximumf %28, %29 : vector<256x64xf32>
    %c0_18 = arith.constant 0 : index
    %c0_19 = arith.constant 0 : index
    %31 = vector.load %arg6[%c0_18, %c0_19] : memref<64x128xf32, #tpu.memory_space<vmem>>, vector<64x128xf32>
    %cst_20 = arith.constant dense<0.000000e+00> : vector<256x128xf32>
    %32 = tpu.matmul %30, %31, %cst_20 {dimension_numbers = #tpu.dot_dimension_numbers<[1], [0], [0], [1], [0, 0, 1, 1], [], []>} : vector<256x64xf32>, vector<64x128xf32>, vector<256x128xf32> -> vector<256x128xf32>
    %c0_21 = arith.constant 0 : index
    %c0_22 = arith.constant 0 : index
    %33 = vector.load %arg7[%c0_21, %c0_22] : memref<1x128xf32, #tpu.memory_space<vmem>>, vector<1x128xf32>
    %34 = vector.broadcast %33 : vector<1x128xf32> to vector<256x128xf32>
    %35 = arith.addf %32, %34 : vector<256x128xf32>
    %c0_23 = arith.constant 0 : index
    %c0_24 = arith.constant 0 : index
    %36 = vector.load %arg8[%c0_23, %c0_24] : memref<256x128xf32, #tpu.memory_space<vmem>>, vector<256x128xf32>
    tpu.vector_store %arg8[%c0_23, %c0_24], %35 {strides = array<i32>} : memref<256x128xf32, #tpu.memory_space<vmem>>, vector<256x128xf32>,
    return
  }
  func.func @transform_0(%arg0: i32) -> (i32, i32) {
    %c0_i32 = arith.constant 0 : i32
    %c0_i32_0 = arith.constant 0 : i32
    return %arg0, %c0_i32 : i32, i32
  }
  func.func @transform_1(%arg0: i32) -> (i32, i32) {
    %c0_i32 = arith.constant 0 : i32
    %c0_i32_0 = arith.constant 0 : i32
    %c0_i32_1 = arith.constant 0 : i32
    return %c0_i32, %c0_i32_0 : i32, i32
  }
  func.func @transform_2(%arg0: i32) -> (i32, i32) {
    %c0_i32 = arith.constant 0 : i32
    %c0_i32_0 = arith.constant 0 : i32
    %c0_i32_1 = arith.constant 0 : i32
    return %c0_i32, %c0_i32_0 : i32, i32
  }
  func.func @transform_3(%arg0: i32) -> (i32, i32) {
    %c0_i32 = arith.constant 0 : i32
    %c0_i32_0 = arith.constant 0 : i32
    %c0_i32_1 = arith.constant 0 : i32
    return %c0_i32, %c0_i32_0 : i32, i32
  }
  func.func @transform_4(%arg0: i32) -> (i32, i32) {
    %c0_i32 = arith.constant 0 : i32
    %c0_i32_0 = arith.constant 0 : i32
    %c0_i32_1 = arith.constant 0 : i32
    return %c0_i32, %c0_i32_0 : i32, i32
  }
  func.func @transform_5(%arg0: i32) -> (i32, i32) {
    %c0_i32 = arith.constant 0 : i32
    %c0_i32_0 = arith.constant 0 : i32
    %c0_i32_1 = arith.constant 0 : i32
    return %c0_i32, %c0_i32_0 : i32, i32
  }
  func.func @transform_6(%arg0: i32) -> (i32, i32) {
    %c0_i32 = arith.constant 0 : i32
    %c0_i32_0 = arith.constant 0 : i32
    %c0_i32_1 = arith.constant 0 : i32
    return %c0_i32, %c0_i32_0 : i32, i32
  }
  func.func @transform_7(%arg0: i32) -> (i32, i32) {
    %c0_i32 = arith.constant 0 : i32
    %c0_i32_0 = arith.constant 0 : i32
    return %arg0, %c0_i32 : i32, i32
  }
}

</mosaic_0001>

<bundles_post_ra>
// kernel: tpu_custom_call.1
= control target key start
LH: loop header
LB: loop body
LE: loop exit
PB: predicated region body
PF: predicated region fallthrough
CT: control target
= control target key end

     0   :  { %12 = vsyncpa [#allocation3], 0  ;;  %s3150_s0 = inlined_call_operand.vmem [shape: f32[512,2], index: 0, kind: input, shape index: {}]   ;;  %s3151_s1 = inlined_call_operand.vmem [shape: f32[2,64], index: 1, kind: input, shape index: {}]   ;;  %s3152_s2 = inlined_call_operand.vmem [shape: f32[1,64], index: 2, kind: input, shape index: {}]   ;;  %s3153_s3 = inlined_call_operand.vmem [shape: f32[64,64], index: 3, kind: input, shape index: {}]   ;;  %s3154_s4 = inlined_call_operand.vmem [shape: f32[1,64], index: 4, kind: input, shape index: {}]   ;;  %s3155_s5 = inlined_call_operand.vmem [shape: f32[64,128], index: 5, kind: input, shape index: {}]   ;;  %s3156_s6 = inlined_call_operand.vmem [shape: f32[1,128], index: 6, kind: input, shape index: {}]   ;;  %s3157_s7 = inlined_call_operand.hbm [shape: f32[512,128], index: 7, kind: output, shape index: {}]  }
   0x1   :  { %14 = vsyncpa [#allocation3 + $0x1], 0  ;;  %s2582_s24 = smov 0   ;;  %s2584_s25 = smov 0  }
   0x2   :  { %s2586_s26 = smov 0   ;;  %s2588_s27 = smov 0  }
   0x3 LB: > { %s2603_s28 = sadd.s32 4294967295, %s2535_s27   ;;  %s1943_s29 = sadd.s32 4294967294, %s2535_s27   ;;  %s2535_s27 = sphi %s2588_s27, %s3163_s27   ;;  %s2531_s26 = sphi %s2586_s26, %s3162_s26   ;;  %s2527_s25 = sphi %s2584_s25, %s3161_s25   ;;  %s2523_s24 = sphi %s2582_s24, %s3160_s24  }
   0x4   : > { %s2607_s30 = sadd.s32 1, %s2535_s27   ;;  %s179_s8 = sadd.s32 1, %s2531_s26 }
   0x5   : > { %s176_s9 = ssub.s32 %s2535_s27, %s2607_s30  ;;  %p189_p0 = scmp.ne.s32.totalorder %s2531_s26, %s2527_s25 }
   0x6   : > { %p177_p1 = scmp.eq.s32.totalorder %s176_s9, 0  ;;  %p190_p2 = scmp.eq.s32.totalorder %s2603_s28, 1 }
   0x7   : > { %p195_p3 = scmp.ne.s32.totalorder %s2527_s25, %s2523_s24  ;;  %p196_p4 = scmp.eq.s32.totalorder %s1943_s29, 1 }
   0x8   : > { %s2618_s10 = scalar_select %p177_p1, %s2531_s26, %s179_s8  }
   0x9   : > { %p2620_p5 = por %p190_p2, %p189_p0  ;;  %p2624_p6 = por %p196_p4, %p195_p3 }
   0xa   : > { %p1946_p7 = scmp.ge.s32.totalorder %s2535_s27, 1  ;;  %p241_p8 = scmp.lt.s32.totalorder %s2535_s27, 3 }
   0xc   : > { %p242_p9 = pnand %p1946_p7, %p241_p8 }
   0xd   : > { %s1948_s13 = sshll.u32 (!%p242_p9), %s2603_s28, 5  ;;  %v2537_v0 = vmov (!%p242_p9), 0   ;;  %v777_v1 = vld [vmem:[%s3153_s3] sm:$0xff] (!%p242_p9)  ;;  %v778_v2 = vld [vmem:[%s3153_s3 + $0x8] sm:$0xff] (!%p242_p9)  ;;  %v2538_v6 = vmov (!%p242_p9), 1   ;;  %v779_v8 = vld [vmem:[%s3153_s3 + $0x10] sm:$0xff] (!%p242_p9) }
   0xe   : > { %245 = sbr.rel (%p242_p9) target bundleno = 953 (0x3b9), region = 48  ;;  %2470 = vset.pattern.permute.xlu1 (!%p242_p9), %v2537_v0  ;;  %2468 = vset.pattern.permute.xlu0 (!%p242_p9), %v2537_v0  ;;  %p274_p10 = scmp.lt.s32.totalorder (!%p242_p9), %s1948_s13, 63  ;;  %v2637_v3 = vpack.c.bf16 (!%p242_p9), %v778_v2, %v777_v1  ;;  %v780_v10 = vld [vmem:[%s3153_s3 + $0x18] sm:$0xff] (!%p242_p9)  ;;  %v781_v12 = vld [vmem:[%s3153_s3 + $0x20] sm:$0xff] (!%p242_p9)  ;;  %v782_v13 = vld [vmem:[%s3153_s3 + $0x28] sm:$0xff] (!%p242_p9)  ;;  %vm792_vm0 = vcmask (!%p242_p9), 523264  }
   0xf   : > { %v2658_v11 = vpack.c.bf16 (!%p242_p9), %v780_v10, %v779_v8  ;;  %v2666_v14 = vpack.c.bf16 (!%p242_p9), %v782_v13, %v781_v12  ;;  %v783_v15 = vld [vmem:[%s3153_s3 + $0x30] sm:$0xff] (!%p242_p9)  ;;  %v784_v16 = vld [vmem:[%s3153_s3 + $0x38] sm:$0xff] (!%p242_p9)  ;;  %v2720_v48 = vld [vmem:[%s3151_s1] ss:$0 sm:$0xff] (!%p242_p9)  ;;  %s270_s16 = sand.u32 (!%p242_p9), 1, %s2527_s25   ;;  %s2056_s22 = sshll.u32 (!%p242_p9), %s2603_s28, 12 }
  0x10   : > { %2370 = vmatprep.subr.bf16.mxu0 (!%p242_p9), %v2637_v3  ;;  %2417 = vmatprep.subr.bf16.mxu1 (!%p242_p9), %v2637_v3  ;;  %v2678_v18 = vpack.c.bf16 (!%p242_p9), %v784_v16, %v783_v15  ;;  %v2725_v49 = vld [vmem:[%s3151_s1 + $0x1] ss:$0 sm:$0xff] (!%p242_p9)  ;;  %v2734_v56 = vld [vmem:[%s3152_s2] ss:$0 sm:$0xff] (!%p242_p9)  ;;  %s1947_s17 = sshll.u32 (!%p242_p9), %s270_s16, 8  ;;  %s3100_s8 = scalar_lea.hbm (!%p242_p9), %s3157_s7, %s2056_s22 }
  0x11   : > { %2372 = vmatpush3.bf16.msra.mxu0 (!%p242_p9), %v2637_v3  ;;  %2421 = vmatpush3.bf16.msra.mxu1 (!%p242_p9), %v2637_v3  ;;  %s3034_s20 = scalar_lea.vmem (!%p242_p9), [#allocation2], %s1947_s17  ;;  %s3109_s28 = scalar_lea.sflag (!%p242_p9), [#allocation3], %s270_s16 }
  0x12   : > { %2374 = vmatprep.subr.bf16.mxu0 (!%p242_p9), %v2658_v11  ;;  %2418 = vmatprep.subr.bf16.mxu1 (!%p242_p9), %v2658_v11  ;;  %s1881_s23 = sshll.u32 (!%p242_p9), %s3034_s20, 4  ;;  %s3102_s23 = int_to_ptr.vmem [resolvable:$true] %s1881_s23 }
  0x13   : > { %s2473_s9 = scalar_lea.vmem (!%p242_p9), %s3102_s23, 4096 }
  0x14   : > { %p2474_p11 = scmp.ne.s32.totalorder (!%p242_p9), %s3102_s23, %s2473_s9 }
  0x15   : > { %s3165_s13 = smov (!%p274_p10, %s1948_s13), 63  ;;  %2376 = vmatpush3.bf16.msra.mxu0 %v2658_v11  ;;  %2422 = vmatpush3.bf16.msra.mxu1 %v2658_v11 }
  0x16   : > { %s1949_s18 = sshll.u32 %s3165_s13, 3  ;;  %2378 = vmatprep.subr.bf16.mxu0 %v2666_v14  ;;  %2419 = vmatprep.subr.bf16.mxu1 %v2666_v14  ;;  %p2475_p12 = pnand %p2474_p11, %p2620_p5 }
  0x17   : > { %s2642_s21 = scalar_lea.vmem %s3150_s0, %s1949_s18  ;;  %s2539_s13 = smov [#allocation2]  }
  0x18   : > { %v281_v4 = vld [vmem:[%s2642_s21 + $0x8] sm:$0xff]  ;;  %v280_v5 = vld [vmem:[%s2642_s21] sm:$0xff]  ;;  %v282_v7 = vld [vmem:[%s2642_s21 + $0x10] sm:$0xff]  ;;  %p2476_p13 = pneg %p2475_p12  ;;  %s2477_s14 = sshll.u32 %s2539_s13, 4  ;;  %s2478_s14 = int_to_ptr.vmem [resolvable:$false] %s2477_s14 }
  0x19   : > { %320 = vperm.xlu1 %2470, %v281_v4   ;;  %315 = vperm.xlu0 %2468, %v280_v5   ;;  %v283_v9 = vld [vmem:[%s2642_s21 + $0x18] sm:$0xff]  ;;  %v284_v17 = vld [vmem:[%s2642_s21 + $0x20] sm:$0xff]  ;;  %v285_v19 = vld [vmem:[%s2642_s21 + $0x28] sm:$0xff]  ;;  %s2479_s15 = scalar_lea.vmem %s2478_s14, 8192  ;;  %p2480_p0 = scmp.lt.s32.totalorder %s3102_s23, %s2478_s14 }
  0x1a   : > { %2380 = vmatpush3.bf16.msra.mxu0 %v2666_v14  ;;  %2423 = vmatpush3.bf16.msra.mxu1 %v2666_v14  ;;  %v286_v20 = vld [vmem:[%s2642_s21 + $0x30] sm:$0xff]  ;;  %v287_v21 = vld [vmem:[%s2642_s21 + $0x38] sm:$0xff]  ;;  %v288_v22 = vld [vmem:[%s2642_s21 + $0x40] sm:$0xff]  ;;  %p2481_p1 = scmp.lt.s32.totalorder %s2479_s15, %s2473_s9 }
  0x1b   : > { %2382 = vmatprep.subr.bf16.mxu0 %v2678_v18  ;;  %2420 = vmatprep.subr.bf16.mxu1 %v2678_v18  ;;  %v289_v23 = vld [vmem:[%s2642_s21 + $0x48] sm:$0xff]  ;;  %v290_v24 = vld [vmem:[%s2642_s21 + $0x50] sm:$0xff]  ;;  %v291_v25 = vld [vmem:[%s2642_s21 + $0x58] sm:$0xff] }
  0x1c   : > { %v292_v26 = vld [vmem:[%s2642_s21 + $0x60] sm:$0xff]  ;;  %v293_v27 = vld [vmem:[%s2642_s21 + $0x68] sm:$0xff]  ;;  %v294_v28 = vld [vmem:[%s2642_s21 + $0x70] sm:$0xff]  ;;  %p2482_p2 = por %p2481_p1, %p2480_p0 }
  0x1d   : > { %2471 = vset.pattern.permute.xlu1 %v2538_v6  ;;  %2469 = vset.pattern.permute.xlu0 %v2538_v6  ;;  %v295_v29 = vld [vmem:[%s2642_s21 + $0x78] sm:$0xff]  ;;  %v296_v30 = vld [vmem:[%s2642_s21 + $0x80] sm:$0xff]  ;;  %v297_v31 = vld [vmem:[%s2642_s21 + $0x88] sm:$0xff] }
  0x1e   : > { %515 = vperm.xlu1 %2471, %v281_v4   ;;  %511 = vperm.xlu0 %2469, %v280_v5   ;;  %v298_v32 = vld [vmem:[%s2642_s21 + $0x90] sm:$0xff]  ;;  %v299_v33 = vld [vmem:[%s2642_s21 + $0x98] sm:$0xff]  ;;  %v300_v34 = vld [vmem:[%s2642_s21 + $0xa0] sm:$0xff]  ;;  %p2483_p3 = pnand %p2482_p2, %p2476_p13 }
  0x1f   : > { %2384 = vmatpush3.bf16.msra.mxu0 %v2678_v18  ;;  %2424 = vmatpush3.bf16.msra.mxu1 %v2678_v18  ;;  %v301_v35 = vld [vmem:[%s2642_s21 + $0xa8] sm:$0xff]  ;;  %v302_v36 = vld [vmem:[%s2642_s21 + $0xb0] sm:$0xff]  ;;  %v303_v37 = vld [vmem:[%s2642_s21 + $0xb8] sm:$0xff] }
  0x20   : > { %2386 = vmatprep.subr.bf16.mxu1 %v2637_v3  ;;  %v304_v38 = vld [vmem:[%s2642_s21 + $0xc0] sm:$0xff]  ;;  %v305_v39 = vld [vmem:[%s2642_s21 + $0xc8] sm:$0xff]  ;;  %v306_v40 = vld [vmem:[%s2642_s21 + $0xd0] sm:$0xff] }
  0x21   : > { %v307_v41 = vld [vmem:[%s2642_s21 + $0xd8] sm:$0xff]  ;;  %v308_v42 = vld [vmem:[%s2642_s21 + $0xe0] sm:$0xff]  ;;  %v309_v43 = vld [vmem:[%s2642_s21 + $0xe8] sm:$0xff] }
  0x22   : > { %2472 = vset.pattern.permute.xlu1 %v2537_v0  ;;  %519 = vperm.xlu0 %2469, %v282_v7   ;;  %v310_v44 = vld [vmem:[%s2642_s21 + $0xf0] sm:$0xff]  ;;  %v311_v45 = vld [vmem:[%s2642_s21 + $0xf8] sm:$0xff] }
  0x23   : > { %325 = vperm.xlu1 %2472, %v282_v7  }
  0x26   : > { %523 = vperm.xlu0 %2469, %v283_v9  }
  0x27   : > { %330 = vperm.xlu1 %2472, %v283_v9  }
  0x2a   : > { %527 = vperm.xlu0 %2469, %v284_v17  }
  0x2b   : > { %335 = vperm.xlu1 %2472, %v284_v17  }
  0x2e   : > { %531 = vperm.xlu0 %2469, %v285_v19  }
  0x2f   : > { %340 = vperm.xlu1 %2472, %v285_v19  }
  0x32   : > { %535 = vperm.xlu0 %2469, %v286_v20  }
  0x33   : > { %345 = vperm.xlu1 %2472, %v286_v20  }
  0x36   : > { %539 = vperm.xlu0 %2469, %v287_v21  }
  0x37   : > { %350 = vperm.xlu1 %2472, %v287_v21  }
  0x3a   : > { %543 = vperm.xlu0 %2469, %v288_v22  }
  0x3b   : > { %355 = vperm.xlu1 %2472, %v288_v22  }
  0x3e   : > { %547 = vperm.xlu0 %2469, %v289_v23  }
  0x3f   : > { %360 = vperm.xlu1 %2472, %v289_v23  }
  0x42   : > { %551 = vperm.xlu0 %2469, %v290_v24  }
  0x43   : > { %365 = vperm.xlu1 %2472, %v290_v24  }
  0x46   : > { %555 = vperm.xlu0 %2469, %v291_v25  }
  0x47   : > { %370 = vperm.xlu1 %2472, %v291_v25  }
  0x4a   : > { %559 = vperm.xlu0 %2469, %v292_v26  }
  0x4b   : > { %375 = vperm.xlu1 %2472, %v292_v26  }
  0x4e   : > { %563 = vperm.xlu0 %2469, %v293_v27  }
  0x4f   : > { %380 = vperm.xlu1 %2472, %v293_v27  }
  0x52   : > { %567 = vperm.xlu0 %2469, %v294_v28  }
  0x53   : > { %385 = vperm.xlu1 %2472, %v294_v28  }
  0x56   : > { %571 = vperm.xlu0 %2469, %v295_v29  }
  0x57   : > { %390 = vperm.xlu1 %2472, %v295_v29  }
  0x5a   : > { %575 = vperm.xlu0 %2469, %v296_v30  }
  0x5b   : > { %395 = vperm.xlu1 %2472, %v296_v30  }
  0x5e   : > { %579 = vperm.xlu0 %2469, %v297_v31  }
  0x5f   : > { %400 = vperm.xlu1 %2472, %v297_v31  }
  0x62   : > { %583 = vperm.xlu0 %2469, %v298_v32  }
  0x63   : > { %405 = vperm.xlu1 %2472, %v298_v32  }
  0x66   : > { %587 = vperm.xlu0 %2469, %v299_v33  }
  0x67   : > { %410 = vperm.xlu1 %2472, %v299_v33  }
  0x6a   : > { %591 = vperm.xlu0 %2469, %v300_v34  }
  0x6b   : > { %415 = vperm.xlu1 %2472, %v300_v34  }
  0x6e   : > { %595 = vperm.xlu0 %2469, %v301_v35  }
  0x6f   : > { %420 = vperm.xlu1 %2472, %v301_v35  }
  0x72   : > { %599 = vperm.xlu0 %2469, %v302_v36  }
  0x73   : > { %425 = vperm.xlu1 %2472, %v302_v36  }
  0x76   : > { %603 = vperm.xlu0 %2469, %v303_v37  }
  0x77   : > { %430 = vperm.xlu1 %2472, %v303_v37  }
  0x7a   : > { %607 = vperm.xlu0 %2469, %v304_v38  }
  0x7b   : > { %435 = vperm.xlu1 %2472, %v304_v38  }
  0x7e   : > { %611 = vperm.xlu0 %2469, %v305_v39  }
  0x7f   : > { %440 = vperm.xlu1 %2472, %v305_v39  }
  0x82   : > { %615 = vperm.xlu0 %2469, %v306_v40  }
  0x83   : > { %445 = vperm.xlu1 %2472, %v306_v40  }
  0x86   : > { %619 = vperm.xlu0 %2469, %v307_v41  }
  0x87   : > { %450 = vperm.xlu1 %2472, %v307_v41  }
  0x8a   : > { %623 = vperm.xlu0 %2469, %v308_v42  }
  0x8b   : > { %455 = vperm.xlu1 %2472, %v308_v42  }
  0x8e   : > { %627 = vperm.xlu0 %2469, %v309_v43  }
  0x8f   : > { %460 = vperm.xlu1 %2472, %v309_v43  }
  0x92   : > { %631 = vperm.xlu0 %2469, %v310_v44  }
  0x93   : > { %465 = vperm.xlu1 %2472, %v310_v44  }
  0x96   : > { %635 = vperm.xlu0 %2469, %v311_v45  }
  0x97   : > { %470 = vperm.xlu1 %2472, %v311_v45  }
  0x98   : > { %v321_v46 = vpop.permute.xlu1 %320  ;;  %v316_v47 = vpop.permute.xlu0 %315 }
  0x99   : > { %v478_v52 = vmul.f32 %v2720_v48, %v321_v46  ;;  %v477_v53 = vmul.f32 %v2720_v48, %v316_v47 }
  0x9d   : > { %v516_v50 = vpop.permute.xlu1 %515  ;;  %v512_v51 = vpop.permute.xlu0 %511 }
  0x9e   : > { %v643_v54 = vmul.f32 %v2725_v49, %v516_v50  ;;  %v642_v55 = vmul.f32 %v2725_v49, %v512_v51 }
  0xa0   : > { %v675_v57 = vadd.f32 %v643_v54, %v478_v52  ;;  %v674_v58 = vadd.f32 %v642_v55, %v477_v53 }
  0xa1   : > { %v520_v59 = vpop.permute.xlu0 %519 }
  0xa2   : > { %v714_v60 = vadd.f32 %v2734_v56, %v675_v57  ;;  %v644_v61 = vmul.f32 %v2725_v49, %v520_v59  ;;  %v326_v62 = vpop.permute.xlu1 %325  ;;  %v713_v63 = vadd.f32 %v2734_v56, %v674_v58 }
  0xa3   : > { %v479_v0 = vmul.f32 %v2720_v48, %v326_v62 }
  0xa4   : > { %v746_v1 = vmax.f32 %v714_v60, 0.0  ;;  %v745_v2 = vmax.f32 %v713_v63, 0.0 }
  0xa5   : > { %v676_v4 = vadd.f32 %v644_v61, %v479_v0  ;;  %v524_v5 = vpop.permute.xlu0 %523 }
  0xa6   : > { %v645_v6 = vmul.f32 %v2725_v49, %v524_v5  ;;  %v331_v7 = vpop.permute.xlu1 %330  ;;  %2193 = vmatprep.mubr.msk.f32.mxu0 %vm792_vm0, %v745_v2 }
  0xa7   : > { %v715_v8 = vadd.f32 %v2734_v56, %v676_v4  ;;  %v480_v9 = vmul.f32 %v2720_v48, %v331_v7  ;;  %2194 = vmatmul.mubr.msk.f32.vlgmr.msra.gmra.mrb[0].mxu0 %vm792_vm0, %v746_v1 }
  0xa9   : > { %v747_v10 = vmax.f32 %v715_v8, 0.0  ;;  %v677_v12 = vadd.f32 %v645_v6, %v480_v9  ;;  %v528_v13 = vpop.permute.xlu0 %527 }
  0xaa   : > { %v646_v15 = vmul.f32 %v2725_v49, %v528_v13  ;;  %v336_v16 = vpop.permute.xlu1 %335 }
  0xab   : > { %v716_v17 = vadd.f32 %v2734_v56, %v677_v12  ;;  %v481_v19 = vmul.f32 %v2720_v48, %v336_v16  ;;  %2196 = vmatprep.mubr.msk.f32.mxu0 %vm792_vm0, %v747_v10 }
  0xad   : > { %v748_v20 = vmax.f32 %v716_v17, 0.0  ;;  %v678_v21 = vadd.f32 %v646_v15, %v481_v19  ;;  %v532_v22 = vpop.permute.xlu0 %531 }
  0xae   : > { %v647_v23 = vmul.f32 %v2725_v49, %v532_v22  ;;  %v341_v24 = vpop.permute.xlu1 %340 }
  0xaf   : > { %v717_v25 = vadd.f32 %v2734_v56, %v678_v21  ;;  %v482_v26 = vmul.f32 %v2720_v48, %v341_v24  ;;  %2197 = vmatmul.mubr.msk.f32.gmra.mrb[2].mxu0 %vm792_vm0, %v748_v20 }
  0xb1   : > { %v749_v27 = vmax.f32 %v717_v25, 0.0  ;;  %v679_v28 = vadd.f32 %v647_v23, %v482_v26  ;;  %v536_v29 = vpop.permute.xlu0 %535 }
  0xb2   : > { %v648_v30 = vmul.f32 %v2725_v49, %v536_v29  ;;  %v346_v31 = vpop.permute.xlu1 %345 }
  0xb3   : > { %v718_v32 = vadd.f32 %v2734_v56, %v679_v28  ;;  %v483_v33 = vmul.f32 %v2720_v48, %v346_v31  ;;  %2199 = vmatprep.mubr.msk.f32.mxu0 %vm792_vm0, %v749_v27 }
  0xb5   : > { %v750_v34 = vmax.f32 %v718_v32, 0.0  ;;  %v680_v35 = vadd.f32 %v648_v30, %v483_v33  ;;  %v540_v36 = vpop.permute.xlu0 %539 }
  0xb6   : > { %v649_v37 = vmul.f32 %v2725_v49, %v540_v36  ;;  %v351_v38 = vpop.permute.xlu1 %350 }
  0xb7   : > { %v719_v39 = vadd.f32 %v2734_v56, %v680_v35  ;;  %v484_v40 = vmul.f32 %v2720_v48, %v351_v38  ;;  %2200 = vmatmul.mubr.msk.f32.gmra.mrb[4].mxu0 %vm792_vm0, %v750_v34 }
  0xb9   : > { %v751_v41 = vmax.f32 %v719_v39, 0.0  ;;  %v681_v42 = vadd.f32 %v649_v37, %v484_v40  ;;  %v544_v43 = vpop.permute.xlu0 %543 }
  0xba   : > { %v650_v44 = vmul.f32 %v2725_v49, %v544_v43  ;;  %v356_v45 = vpop.permute.xlu1 %355 }
  0xbb   : > { %v720_v46 = vadd.f32 %v2734_v56, %v681_v42  ;;  %v485_v47 = vmul.f32 %v2720_v48, %v356_v45  ;;  %2202 = vmatprep.mubr.msk.f32.mxu0 %vm792_vm0, %v751_v41 }
  0xbd   : > { %v752_v50 = vmax.f32 %v720_v46, 0.0  ;;  %v682_v51 = vadd.f32 %v650_v44, %v485_v47  ;;  %v548_v52 = vpop.permute.xlu0 %547 }
  0xbe   : > { %v651_v53 = vmul.f32 %v2725_v49, %v548_v52  ;;  %v361_v54 = vpop.permute.xlu1 %360 }
  0xbf   : > { %v721_v55 = vadd.f32 %v2734_v56, %v682_v51  ;;  %v486_v57 = vmul.f32 %v2720_v48, %v361_v54  ;;  %2203 = vmatmul.mubr.msk.f32.gmra.mrb[6].mxu0 %vm792_vm0, %v752_v50 }
  0xc1   : > { %v753_v58 = vmax.f32 %v721_v55, 0.0  ;;  %v683_v59 = vadd.f32 %v651_v53, %v486_v57  ;;  %v552_v60 = vpop.permute.xlu0 %551 }
  0xc2   : > { %v652_v61 = vmul.f32 %v2725_v49, %v552_v60  ;;  %v366_v62 = vpop.permute.xlu1 %365 }
  0xc3   : > { %v722_v63 = vadd.f32 %v2734_v56, %v683_v59  ;;  %v487_v0 = vmul.f32 %v2720_v48, %v366_v62  ;;  %2205 = vmatprep.mubr.msk.f32.mxu0 %vm792_vm0, %v753_v58 }
  0xc5   : > { %v754_v1 = vmax.f32 %v722_v63, 0.0  ;;  %v684_v2 = vadd.f32 %v652_v61, %v487_v0  ;;  %v556_v4 = vpop.permute.xlu0 %555 }
  0xc6   : > { %v653_v5 = vmul.f32 %v2725_v49, %v556_v4  ;;  %v371_v6 = vpop.permute.xlu1 %370 }
  0xc7   : > { %v723_v7 = vadd.f32 %v2734_v56, %v684_v2  ;;  %v488_v8 = vmul.f32 %v2720_v48, %v371_v6  ;;  %2206 = vmatmul.mubr.msk.f32.gmra.mrb[8].mxu0 %vm792_vm0, %v754_v1 }
  0xc9   : > { %v755_v9 = vmax.f32 %v723_v7, 0.0  ;;  %v685_v10 = vadd.f32 %v653_v5, %v488_v8  ;;  %v560_v12 = vpop.permute.xlu0 %559 }
  0xca   : > { %v654_v13 = vmul.f32 %v2725_v49, %v560_v12  ;;  %v376_v15 = vpop.permute.xlu1 %375 }
  0xcb   : > { %v724_v16 = vadd.f32 %v2734_v56, %v685_v10  ;;  %v489_v17 = vmul.f32 %v2720_v48, %v376_v15  ;;  %2208 = vmatprep.mubr.msk.f32.mxu0 %vm792_vm0, %v755_v9 }
  0xcd   : > { %v756_v19 = vmax.f32 %v724_v16, 0.0  ;;  %v686_v20 = vadd.f32 %v654_v13, %v489_v17  ;;  %v564_v21 = vpop.permute.xlu0 %563 }
  0xce   : > { %v655_v22 = vmul.f32 %v2725_v49, %v564_v21  ;;  %v381_v23 = vpop.permute.xlu1 %380 }
  0xcf   : > { %v725_v24 = vadd.f32 %v2734_v56, %v686_v20  ;;  %v490_v25 = vmul.f32 %v2720_v48, %v381_v23  ;;  %2209 = vmatmul.mubr.msk.f32.gmra.mrb[10].mxu0 %vm792_vm0, %v756_v19 }
  0xd1   : > { %v757_v26 = vmax.f32 %v725_v24, 0.0  ;;  %v687_v27 = vadd.f32 %v655_v22, %v490_v25  ;;  %v568_v28 = vpop.permute.xlu0 %567 }
  0xd2   : > { %v656_v29 = vmul.f32 %v2725_v49, %v568_v28  ;;  %v386_v30 = vpop.permute.xlu1 %385 }
  0xd3   : > { %v726_v31 = vadd.f32 %v2734_v56, %v687_v27  ;;  %v491_v32 = vmul.f32 %v2720_v48, %v386_v30  ;;  %2211 = vmatprep.mubr.msk.f32.mxu0 %vm792_vm0, %v757_v26 }
  0xd5   : > { %v758_v33 = vmax.f32 %v726_v31, 0.0  ;;  %v688_v34 = vadd.f32 %v656_v29, %v491_v32  ;;  %v572_v35 = vpop.permute.xlu0 %571 }
  0xd6   : > { %v657_v36 = vmul.f32 %v2725_v49, %v572_v35  ;;  %v391_v37 = vpop.permute.xlu1 %390 }
  0xd7   : > { %v727_v38 = vadd.f32 %v2734_v56, %v688_v34  ;;  %v492_v39 = vmul.f32 %v2720_v48, %v391_v37  ;;  %2212 = vmatmul.mubr.msk.f32.gmra.mrb[12].mxu0 %vm792_vm0, %v758_v33 }
  0xd9   : > { %v759_v40 = vmax.f32 %v727_v38, 0.0  ;;  %v689_v41 = vadd.f32 %v657_v36, %v492_v39  ;;  %v576_v42 = vpop.permute.xlu0 %575 }
  0xda   : > { %v658_v43 = vmul.f32 %v2725_v49, %v576_v42  ;;  %v396_v44 = vpop.permute.xlu1 %395 }
  0xdb   : > { %v728_v45 = vadd.f32 %v2734_v56, %v689_v41  ;;  %v493_v46 = vmul.f32 %v2720_v48, %v396_v44  ;;  %2214 = vmatprep.mubr.msk.f32.mxu0 %vm792_vm0, %v759_v40 }
  0xdd   : > { %v760_v47 = vmax.f32 %v728_v45, 0.0  ;;  %v690_v50 = vadd.f32 %v658_v43, %v493_v46  ;;  %v580_v51 = vpop.permute.xlu0 %579 }
  0xde   : > { %v659_v52 = vmul.f32 %v2725_v49, %v580_v51  ;;  %v401_v53 = vpop.permute.xlu1 %400 }
  0xdf   : > { %v494_v54 = vmul.f32 %v2720_v48, %v401_v53  ;;  %2215 = vmatmul.mubr.msk.f32.gmra.mrb[14].mxu0 %vm792_vm0, %v760_v47  ;;  %v729_v55 = vadd.f32 %v2734_v56, %v690_v50 }
  0xe1   : > { %v691_v57 = vadd.f32 %v659_v52, %v494_v54  ;;  %v584_v58 = vpop.permute.xlu0 %583  ;;  %v761_v59 = vmax.f32 %v729_v55, 0.0 }
  0xe2   : > { %v660_v60 = vmul.f32 %v2725_v49, %v584_v58  ;;  %v406_v61 = vpop.permute.xlu1 %405 }
  0xe3   : > { %v730_v62 = vadd.f32 %v2734_v56, %v691_v57  ;;  %v495_v63 = vmul.f32 %v2720_v48, %v406_v61  ;;  %2217 = vmatprep.mubr.msk.f32.mxu1 %vm792_vm0, %v761_v59 }
  0xe5   : > { %v762_v0 = vmax.f32 %v730_v62, 0.0  ;;  %v692_v1 = vadd.f32 %v660_v60, %v495_v63  ;;  %v588_v2 = vpop.permute.xlu0 %587 }
  0xe6   : > { %v661_v4 = vmul.f32 %v2725_v49, %v588_v2  ;;  %v411_v5 = vpop.permute.xlu1 %410 }
  0xe7   : > { %v731_v6 = vadd.f32 %v2734_v56, %v692_v1  ;;  %v496_v7 = vmul.f32 %v2720_v48, %v411_v5  ;;  %2218 = vmatmul.mubr.msk.f32.vlgmr.msra.gmra.mrb[0].mxu1 %vm792_vm0, %v762_v0 }
  0xe8   : > { %2388 = vmatpush3.bf16.msra.mxu1 %v2637_v3 }
  0xe9   : > { %v763_v8 = vmax.f32 %v731_v6, 0.0  ;;  %v693_v9 = vadd.f32 %v661_v4, %v496_v7  ;;  %v592_v10 = vpop.permute.xlu0 %591  ;;  %2390 = vmatprep.subr.bf16.mxu1 %v2658_v11 }
  0xea   : > { %v662_v12 = vmul.f32 %v2725_v49, %v592_v10  ;;  %v416_v13 = vpop.permute.xlu1 %415 }
  0xeb   : > { %v732_v15 = vadd.f32 %v2734_v56, %v693_v9  ;;  %v497_v16 = vmul.f32 %v2720_v48, %v416_v13  ;;  %2220 = vmatprep.mubr.msk.f32.mxu1 %vm792_vm0, %v763_v8 }
  0xec   : > { %2392 = vmatpush3.bf16.msra.mxu1 %v2658_v11 }
  0xed   : > { %v764_v17 = vmax.f32 %v732_v15, 0.0  ;;  %v694_v19 = vadd.f32 %v662_v12, %v497_v16  ;;  %v596_v20 = vpop.permute.xlu0 %595  ;;  %2394 = vmatprep.subr.bf16.mxu1 %v2666_v14 }
  0xee   : > { %v663_v3 = vmul.f32 %v2725_v49, %v596_v20  ;;  %v421_v21 = vpop.permute.xlu1 %420 }
  0xef   : > { %v733_v22 = vadd.f32 %v2734_v56, %v694_v19  ;;  %v498_v23 = vmul.f32 %v2720_v48, %v421_v21  ;;  %2221 = vmatmul.mubr.msk.f32.gmra.mrb[2].mxu1 %vm792_vm0, %v764_v17 }
  0xf0   : > { %2396 = vmatpush3.bf16.msra.mxu1 %v2666_v14 }
  0xf1   : > { %v765_v24 = vmax.f32 %v733_v22, 0.0  ;;  %v695_v25 = vadd.f32 %v663_v3, %v498_v23  ;;  %v600_v26 = vpop.permute.xlu0 %599  ;;  %2398 = vmatprep.subr.bf16.mxu1 %v2678_v18 }
  0xf2   : > { %v664_v11 = vmul.f32 %v2725_v49, %v600_v26  ;;  %v426_v27 = vpop.permute.xlu1 %425 }
  0xf3   : > { %v734_v28 = vadd.f32 %v2734_v56, %v695_v25  ;;  %v499_v29 = vmul.f32 %v2720_v48, %v426_v27  ;;  %2223 = vmatprep.mubr.msk.f32.mxu1 %vm792_vm0, %v765_v24 }
  0xf4   : > { %2400 = vmatpush3.bf16.msra.mxu1 %v2678_v18 }
  0xf5   : > { %v766_v30 = vmax.f32 %v734_v28, 0.0  ;;  %v696_v31 = vadd.f32 %v664_v11, %v499_v29  ;;  %v604_v32 = vpop.permute.xlu0 %603 }
  0xf6   : > { %v665_v14 = vmul.f32 %v2725_v49, %v604_v32  ;;  %v431_v33 = vpop.permute.xlu1 %430 }
  0xf7   : > { %v735_v34 = vadd.f32 %v2734_v56, %v696_v31  ;;  %v500_v35 = vmul.f32 %v2720_v48, %v431_v33  ;;  %2224 = vmatmul.mubr.msk.f32.gmra.mrb[4].mxu1 %vm792_vm0, %v766_v30 }
  0xf9   : > { %v767_v36 = vmax.f32 %v735_v34, 0.0  ;;  %v697_v37 = vadd.f32 %v665_v14, %v500_v35  ;;  %v608_v38 = vpop.permute.xlu0 %607  ;;  %v1500_v35 = vld [vmem:[%s3155_s5 + $0x8] sm:$0xff] }
  0xfa   : > { %v666_v39 = vmul.f32 %v2725_v49, %v608_v38  ;;  %v436_v40 = vpop.permute.xlu1 %435  ;;  %v1502_v38 = vld [vmem:[%s3155_s5 + $0x18] sm:$0xff] }
  0xfb   : > { %v736_v18 = vadd.f32 %v2734_v56, %v697_v37  ;;  %v501_v41 = vmul.f32 %v2720_v48, %v436_v40  ;;  %2226 = vmatprep.mubr.msk.f32.mxu1 %vm792_vm0, %v767_v36 }
  0xfd   : > { %v768_v42 = vmax.f32 %v736_v18, 0.0  ;;  %v698_v43 = vadd.f32 %v666_v39, %v501_v41  ;;  %v612_v44 = vpop.permute.xlu0 %611  ;;  %v1503_v41 = vld [vmem:[%s3155_s5 + $0x20] sm:$0xff] }
  0xfe   : > { %v667_v45 = vmul.f32 %v2725_v49, %v612_v44  ;;  %v441_v46 = vpop.permute.xlu1 %440 }
  0xff   : > { %v737_v47 = vadd.f32 %v2734_v56, %v698_v43  ;;  %v502_v50 = vmul.f32 %v2720_v48, %v441_v46  ;;  %2227 = vmatmul.mubr.msk.f32.gmra.mrb[6].mxu1 %vm792_vm0, %v768_v42  ;;  %v1504_v42 = vld [vmem:[%s3155_s5 + $0x28] sm:$0xff] }
 0x101   : > { %v769_v51 = vmax.f32 %v737_v47, 0.0  ;;  %v699_v52 = vadd.f32 %v667_v45, %v502_v50  ;;  %v616_v53 = vpop.permute.xlu0 %615  ;;  %v2409_v45 = vpack.c.bf16 %v1504_v42, %v1503_v41 }
 0x102   : > { %v668_v54 = vmul.f32 %v2725_v49, %v616_v53  ;;  %v446_v55 = vpop.permute.xlu1 %445 }
 0x103   : > { %v738_v57 = vadd.f32 %v2734_v56, %v699_v52  ;;  %v503_v58 = vmul.f32 %v2720_v48, %v446_v55  ;;  %2229 = vmatprep.mubr.msk.f32.mxu1 %vm792_vm0, %v769_v51 }
 0x105   : > { %v770_v59 = vmax.f32 %v738_v57, 0.0  ;;  %v700_v60 = vadd.f32 %v668_v54, %v503_v58  ;;  %v620_v61 = vpop.permute.xlu0 %619 }
 0x106   : > { %v669_v62 = vmul.f32 %v2725_v49, %v620_v61  ;;  %v451_v63 = vpop.permute.xlu1 %450 }
 0x107   : > { %v739_v0 = vadd.f32 %v2734_v56, %v700_v60  ;;  %v504_v1 = vmul.f32 %v2720_v48, %v451_v63  ;;  %2230 = vmatmul.mubr.msk.f32.gmra.mrb[8].mxu1 %vm792_vm0, %v770_v59 }
 0x109   : > { %v771_v2 = vmax.f32 %v739_v0, 0.0  ;;  %v701_v4 = vadd.f32 %v669_v62, %v504_v1  ;;  %v624_v5 = vpop.permute.xlu0 %623 }
 0x10a   : > { %v670_v6 = vmul.f32 %v2725_v49, %v624_v5  ;;  %v456_v7 = vpop.permute.xlu1 %455 }
 0x10b   : > { %v740_v8 = vadd.f32 %v2734_v56, %v701_v4  ;;  %v505_v9 = vmul.f32 %v2720_v48, %v456_v7  ;;  %2232 = vmatprep.mubr.msk.f32.mxu1 %vm792_vm0, %v771_v2 }
 0x10d   : > { %v772_v10 = vmax.f32 %v740_v8, 0.0  ;;  %v702_v12 = vadd.f32 %v670_v6, %v505_v9  ;;  %v628_v13 = vpop.permute.xlu0 %627 }
 0x10e   : > { %v671_v15 = vmul.f32 %v2725_v49, %v628_v13  ;;  %v461_v16 = vpop.permute.xlu1 %460 }
 0x10f   : > { %v741_v17 = vadd.f32 %v2734_v56, %v702_v12  ;;  %v506_v19 = vmul.f32 %v2720_v48, %v461_v16  ;;  %2233 = vmatmul.mubr.msk.f32.gmra.mrb[10].mxu1 %vm792_vm0, %v772_v10 }
 0x111   : > { %v773_v20 = vmax.f32 %v741_v17, 0.0  ;;  %v703_v3 = vadd.f32 %v671_v15, %v506_v19  ;;  %v632_v21 = vpop.permute.xlu0 %631 }
 0x112   : > { %v672_v22 = vmul.f32 %v2725_v49, %v632_v21  ;;  %v466_v23 = vpop.permute.xlu1 %465 }
 0x113   : > { %v742_v24 = vadd.f32 %v2734_v56, %v703_v3  ;;  %v507_v25 = vmul.f32 %v2720_v48, %v466_v23  ;;  %2235 = vmatprep.mubr.msk.f32.mxu1 %vm792_vm0, %v773_v20 }
 0x115   : > { %v774_v26 = vmax.f32 %v742_v24, 0.0  ;;  %v704_v11 = vadd.f32 %v672_v22, %v507_v25  ;;  %v636_v27 = vpop.permute.xlu0 %635 }
 0x116   : > { %v673_v28 = vmul.f32 %v2725_v49, %v636_v27  ;;  %v471_v29 = vpop.permute.xlu1 %470  ;;  %v2870_v49 = vld [vmem:[%s3154_s4] ss:$0 sm:$0xff] }
 0x117   : > { %v743_v30 = vadd.f32 %v2734_v56, %v704_v11  ;;  %v508_v31 = vmul.f32 %v2720_v48, %v471_v29  ;;  %2236 = vmatmul.mubr.msk.f32.gmra.mrb[12].mxu1 %vm792_vm0, %v774_v26  ;;  %v1499_v48 = vld [vmem:[%s3155_s5] sm:$0xff] }
 0x118   : > { %v2401_v37 = vpack.c.bf16 %v1500_v35, %v1499_v48 }
 0x119   : > { %v775_v32 = vmax.f32 %v743_v30, 0.0  ;;  %v705_v14 = vadd.f32 %v673_v28, %v508_v31 }
 0x11a   : > { %2402 = vmatprep.subr.bf16.mxu0 %v2401_v37 }
 0x11b   : > { %v744_v33 = vadd.f32 %v2734_v56, %v705_v14  ;;  %2238 = vmatprep.mubr.msk.f32.mxu1 %vm792_vm0, %v775_v32  ;;  %v1501_v56 = vld [vmem:[%s3155_s5 + $0x10] sm:$0xff]  ;;  %2404 = vmatpush3.bf16.msra.mxu0 %v2401_v37 }
 0x11c   : > { %v2405_v18 = vpack.c.bf16 %v1502_v38, %v1501_v56 }
 0x11d   : > { %v776_v34 = vmax.f32 %v744_v33, 0.0 }
 0x11e   : > { %2406 = vmatprep.subr.bf16.mxu0 %v2405_v18 }
 0x11f   : > { %2239 = vmatmul.mubr.msk.f32.gmra.mrb[14].mxu1 %vm792_vm0, %v776_v34  ;;  %2408 = vmatpush3.bf16.msra.mxu0 %v2405_v18 }
 0x120   : > { %2410 = vmatprep.subr.bf16.mxu0 %v2409_v45 }
 0x123   : > { %2412 = vmatpush3.bf16.msra.mxu0 %v2409_v45 }
 0x17a   : > { %v2195_v36 = vpop.f32.mrb[0].mxu0 }
 0x17b   : > { %v961_v39 = vadd.f32 %v2195_v36, %v2870_v49  ;;  %v955_v40 = vpop.f32.mrb[1].mxu0 }
 0x17c   : > { %v956_v43 = vadd.f32 %v2870_v49, %v955_v40 }
 0x17d   : > { %v1115_v46 = vmax.f32 %v961_v39, 0.0 }
 0x17e   : > { %v1114_v44 = vmax.f32 %v956_v43, 0.0 }
 0x180   : > { %2257 = vmatprep.mubr.msk.f32.mxu1 %vm792_vm0, %v1114_v44 }
 0x181   : > { %2258 = vmatmul.mubr.msk.f32.vlgmr.msra.gmra.mrb[16].mxu1 %vm792_vm0, %v1115_v46 }
 0x182   : > { %v2198_v47 = vpop.f32.mrb[2].mxu0 }
 0x183   : > { %v971_v50 = vadd.f32 %v2198_v47, %v2870_v49  ;;  %v965_v51 = vpop.f32.mrb[3].mxu0 }
 0x184   : > { %v966_v52 = vadd.f32 %v2870_v49, %v965_v51  ;;  %v1506_v51 = vld [vmem:[%s3155_s5 + $0x38] sm:$0xff] }
 0x185   : > { %v1117_v54 = vmax.f32 %v971_v50, 0.0  ;;  %v1505_v50 = vld [vmem:[%s3155_s5 + $0x30] sm:$0xff] }
 0x186   : > { %v1116_v53 = vmax.f32 %v966_v52, 0.0  ;;  %v2413_v52 = vpack.c.bf16 %v1506_v51, %v1505_v50 }
 0x188   : > { %2260 = vmatprep.mubr.msk.f32.mxu1 %vm792_vm0, %v1116_v53  ;;  %2414 = vmatprep.subr.bf16.mxu0 %v2413_v52 }
 0x189   : > { %2261 = vmatmul.mubr.msk.f32.gmra.mrb[18].mxu1 %vm792_vm0, %v1117_v54  ;;  %2416 = vmatpush3.bf16.msra.mxu0 %v2413_v52 }
 0x18a   : > { %v2201_v55 = vpop.f32.mrb[4].mxu0 }
 0x18b   : > { %v981_v57 = vadd.f32 %v2201_v55, %v2870_v49  ;;  %v975_v58 = vpop.f32.mrb[5].mxu0 }
 0x18c   : > { %v976_v59 = vadd.f32 %v2870_v49, %v975_v58 }
 0x18d   : > { %v1119_v61 = vmax.f32 %v981_v57, 0.0 }
 0x18e   : > { %v1118_v60 = vmax.f32 %v976_v59, 0.0 }
 0x190   : > { %2263 = vmatprep.mubr.msk.f32.mxu1 %vm792_vm0, %v1118_v60 }
 0x191   : > { %2264 = vmatmul.mubr.msk.f32.gmra.mrb[20].mxu1 %vm792_vm0, %v1119_v61 }
 0x192   : > { %v2204_v62 = vpop.f32.mrb[6].mxu0 }
 0x193   : > { %v991_v63 = vadd.f32 %v2204_v62, %v2870_v49  ;;  %v985_v0 = vpop.f32.mrb[7].mxu0 }
 0x194   : > { %v986_v1 = vadd.f32 %v2870_v49, %v985_v0 }
 0x195   : > { %v1121_v4 = vmax.f32 %v991_v63, 0.0 }
 0x196   : > { %v1120_v2 = vmax.f32 %v986_v1, 0.0 }
 0x198   : > { %2266 = vmatprep.mubr.msk.f32.mxu1 %vm792_vm0, %v1120_v2 }
 0x199   : > { %2267 = vmatmul.mubr.msk.f32.gmra.mrb[22].mxu1 %vm792_vm0, %v1121_v4 }
 0x19a   : > { %v2207_v5 = vpop.f32.mrb[8].mxu0 }
 0x19b   : > { %v1001_v6 = vadd.f32 %v2207_v5, %v2870_v49  ;;  %v995_v7 = vpop.f32.mrb[9].mxu0 }
 0x19c   : > { %v996_v8 = vadd.f32 %v2870_v49, %v995_v7 }
 0x19d   : > { %v1123_v10 = vmax.f32 %v1001_v6, 0.0 }
 0x19e   : > { %v1122_v9 = vmax.f32 %v996_v8, 0.0 }
 0x1a0   : > { %2269 = vmatprep.mubr.msk.f32.mxu1 %vm792_vm0, %v1122_v9 }
 0x1a1   : > { %2270 = vmatmul.mubr.msk.f32.gmra.mrb[24].mxu1 %vm792_vm0, %v1123_v10 }
 0x1a2   : > { %v2210_v12 = vpop.f32.mrb[10].mxu0 }
 0x1a3   : > { %v1011_v13 = vadd.f32 %v2210_v12, %v2870_v49  ;;  %v1005_v15 = vpop.f32.mrb[11].mxu0 }
 0x1a4   : > { %v1006_v16 = vadd.f32 %v2870_v49, %v1005_v15 }
 0x1a5   : > { %v1125_v19 = vmax.f32 %v1011_v13, 0.0 }
 0x1a6   : > { %v1124_v17 = vmax.f32 %v1006_v16, 0.0 }
 0x1a8   : > { %2272 = vmatprep.mubr.msk.f32.mxu1 %vm792_vm0, %v1124_v17 }
 0x1a9   : > { %2273 = vmatmul.mubr.msk.f32.gmra.mrb[26].mxu1 %vm792_vm0, %v1125_v19 }
 0x1aa   : > { %v2213_v20 = vpop.f32.mrb[12].mxu0 }
 0x1ab   : > { %v1021_v3 = vadd.f32 %v2213_v20, %v2870_v49  ;;  %v1015_v21 = vpop.f32.mrb[13].mxu0 }
 0x1ac   : > { %v1016_v22 = vadd.f32 %v2870_v49, %v1015_v21 }
 0x1ad   : > { %v1127_v24 = vmax.f32 %v1021_v3, 0.0 }
 0x1ae   : > { %v1126_v23 = vmax.f32 %v1016_v22, 0.0 }
 0x1b0   : > { %2275 = vmatprep.mubr.msk.f32.mxu1 %vm792_vm0, %v1126_v23 }
 0x1b1   : > { %2276 = vmatmul.mubr.msk.f32.gmra.mrb[28].mxu1 %vm792_vm0, %v1127_v24 }
 0x1b2   : > { %v2216_v25 = vpop.f32.mrb[14].mxu0 }
 0x1b3   : > { %v1031_v26 = vadd.f32 %v2216_v25, %v2870_v49  ;;  %v1025_v11 = vpop.f32.mrb[15].mxu0 }
 0x1b4   : > { %v1026_v27 = vadd.f32 %v2870_v49, %v1025_v11 }
 0x1b5   : > { %v1129_v29 = vmax.f32 %v1031_v26, 0.0 }
 0x1b6   : > { %v1128_v28 = vmax.f32 %v1026_v27, 0.0 }
 0x1b8   : > { %2278 = vmatprep.mubr.msk.f32.mxu1 %vm792_vm0, %v1128_v28 }
 0x1b9   : > { %2279 = vmatmul.mubr.msk.f32.gmra.mrb[30].mxu1 %vm792_vm0, %v1129_v29 }
 0x1ba   : > { %v2219_v30 = vpop.f32.mrb[0].mxu1 }
 0x1bb   : > { %v1041_v31 = vadd.f32 %v2219_v30, %v2870_v49  ;;  %v1035_v32 = vpop.f32.mrb[1].mxu1 }
 0x1bc   : > { %v1036_v14 = vadd.f32 %v2870_v49, %v1035_v32 }
 0x1bd   : > { %v1131_v34 = vmax.f32 %v1041_v31, 0.0 }
 0x1be   : > { %v1130_v33 = vmax.f32 %v1036_v14, 0.0 }
 0x1c0   : > { %2281 = vmatprep.mubr.msk.f32.mxu1 %vm792_vm0, %v1130_v33 }
 0x1c1   : > { %2282 = vmatmul.mubr.msk.f32.gmra.mrb[32].mxu1 %vm792_vm0, %v1131_v34 }
 0x1c2   : > { %v2222_v48 = vpop.f32.mrb[2].mxu1 }
 0x1c3   : > { %v1051_v35 = vadd.f32 %v2222_v48, %v2870_v49  ;;  %v1045_v56 = vpop.f32.mrb[3].mxu1 }
 0x1c4   : > { %v1046_v36 = vadd.f32 %v2870_v49, %v1045_v56 }
 0x1c5   : > { %v1133_v38 = vmax.f32 %v1051_v35, 0.0 }
 0x1c6   : > { %v1132_v37 = vmax.f32 %v1046_v36, 0.0 }
 0x1c8   : > { %2284 = vmatprep.mubr.msk.f32.mxu1 %vm792_vm0, %v1132_v37 }
 0x1c9   : > { %2285 = vmatmul.mubr.msk.f32.gmra.mrb[34].mxu1 %vm792_vm0, %v1133_v38 }
 0x1ca   : > { %v2225_v39 = vpop.f32.mrb[4].mxu1 }
 0x1cb   : > { %v1061_v40 = vadd.f32 %v2225_v39, %v2870_v49  ;;  %v1055_v18 = vpop.f32.mrb[5].mxu1 }
 0x1cc   : > { %v1056_v41 = vadd.f32 %v2870_v49, %v1055_v18 }
 0x1cd   : > { %v1135_v43 = vmax.f32 %v1061_v40, 0.0 }
 0x1ce   : > { %v1134_v42 = vmax.f32 %v1056_v41, 0.0 }
 0x1d0   : > { %2287 = vmatprep.mubr.msk.f32.mxu1 %vm792_vm0, %v1134_v42 }
 0x1d1   : > { %2288 = vmatmul.mubr.msk.f32.gmra.mrb[36].mxu1 %vm792_vm0, %v1135_v43 }
 0x1d2   : > { %v2228_v44 = vpop.f32.mrb[6].mxu1 }
 0x1d3   : > { %v1071_v45 = vadd.f32 %v2228_v44, %v2870_v49  ;;  %v1065_v46 = vpop.f32.mrb[7].mxu1 }
 0x1d4   : > { %v1066_v47 = vadd.f32 %v2870_v49, %v1065_v46 }
 0x1d5   : > { %v1137_v54 = vmax.f32 %v1071_v45, 0.0 }
 0x1d6   : > { %v1136_v53 = vmax.f32 %v1066_v47, 0.0 }
 0x1d8   : > { %2290 = vmatprep.mubr.msk.f32.mxu1 %vm792_vm0, %v1136_v53 }
 0x1d9   : > { %2291 = vmatmul.mubr.msk.f32.gmra.mrb[38].mxu1 %vm792_vm0, %v1137_v54 }
 0x1da   : > { %v2231_v55 = vpop.f32.mrb[8].mxu1 }
 0x1db   : > { %v1081_v57 = vadd.f32 %v2231_v55, %v2870_v49  ;;  %v1075_v58 = vpop.f32.mrb[9].mxu1 }
 0x1dc   : > { %v1076_v59 = vadd.f32 %v2870_v49, %v1075_v58 }
 0x1dd   : > { %v1139_v61 = vmax.f32 %v1081_v57, 0.0 }
 0x1de   : > { %v1138_v60 = vmax.f32 %v1076_v59, 0.0 }
 0x1e0   : > { %2293 = vmatprep.mubr.msk.f32.mxu1 %vm792_vm0, %v1138_v60 }
 0x1e1   : > { %2294 = vmatmul.mubr.msk.f32.gmra.mrb[40].mxu1 %vm792_vm0, %v1139_v61 }
 0x1e2   : > { %v2234_v62 = vpop.f32.mrb[10].mxu1 }
 0x1e3   : > { %v1091_v63 = vadd.f32 %v2234_v62, %v2870_v49  ;;  %v1085_v0 = vpop.f32.mrb[11].mxu1 }
 0x1e4   : > { %v1086_v1 = vadd.f32 %v2870_v49, %v1085_v0 }
 0x1e5   : > { %v1141_v4 = vmax.f32 %v1091_v63, 0.0 }
 0x1e6   : > { %v1140_v2 = vmax.f32 %v1086_v1, 0.0 }
 0x1e8   : > { %2296 = vmatprep.mubr.msk.f32.mxu1 %vm792_vm0, %v1140_v2 }
 0x1e9   : > { %2297 = vmatmul.mubr.msk.f32.gmra.mrb[42].mxu1 %vm792_vm0, %v1141_v4 }
 0x1ea   : > { %v2237_v5 = vpop.f32.mrb[12].mxu1 }
 0x1eb   : > { %v1101_v6 = vadd.f32 %v2237_v5, %v2870_v49  ;;  %v1095_v7 = vpop.f32.mrb[13].mxu1 }
 0x1ec   : > { %v1096_v8 = vadd.f32 %v2870_v49, %v1095_v7 }
 0x1ed   : > { %v1143_v10 = vmax.f32 %v1101_v6, 0.0 }
 0x1ee   : > { %v1142_v9 = vmax.f32 %v1096_v8, 0.0 }
 0x1f0   : > { %2299 = vmatprep.mubr.msk.f32.mxu1 %vm792_vm0, %v1142_v9 }
 0x1f1   : > { %2300 = vmatmul.mubr.msk.f32.gmra.mrb[44].mxu1 %vm792_vm0, %v1143_v10 }
 0x1f2   : > { %v2240_v12 = vpop.f32.mrb[14].mxu1 }
 0x1f3   : > { %v1111_v13 = vadd.f32 %v2240_v12, %v2870_v49  ;;  %v1105_v15 = vpop.f32.mrb[15].mxu1 }
 0x1f4   : > { %v1106_v16 = vadd.f32 %v2870_v49, %v1105_v15 }
 0x1f5   : > { %v1145_v19 = vmax.f32 %v1111_v13, 0.0 }
 0x1f6   : > { %v1144_v17 = vmax.f32 %v1106_v16, 0.0 }
 0x1f8   : > { %2302 = vmatprep.mubr.msk.f32.mxu1 %vm792_vm0, %v1144_v17 }
 0x1f9   : > { %2303 = vmatmul.mubr.msk.f32.gmra.mrb[46].mxu1 %vm792_vm0, %v1145_v19 }
 0x254   : > { %v2259_v20 = vpop.f32.mrb[16].mxu1 }
 0x255   : > { %v1314_v3 = vadd.f32 %v2259_v20, %v2870_v49  ;;  %v1308_v21 = vpop.f32.mrb[17].mxu1 }
 0x256   : > { %v1309_v22 = vadd.f32 %v2870_v49, %v1308_v21 }
 0x257   : > { %v1468_v24 = vmax.f32 %v1314_v3, 0.0 }
 0x258   : > { %v1467_v23 = vmax.f32 %v1309_v22, 0.0 }
 0x25a   : > { %2321 = vmatprep.mubr.msk.f32.mxu0 %vm792_vm0, %v1467_v23 }
 0x25b   : > { %2322 = vmatmul.mubr.msk.f32.vlgmr.msra.gmra.mrb[16].mxu0 %vm792_vm0, %v1468_v24 }
 0x25c   : > { %v2262_v25 = vpop.f32.mrb[18].mxu1 }
 0x25d   : > { %v1324_v26 = vadd.f32 %v2262_v25, %v2870_v49  ;;  %v1318_v11 = vpop.f32.mrb[19].mxu1 }
 0x25e   : > { %v1319_v27 = vadd.f32 %v2870_v49, %v1318_v11 }
 0x25f   : > { %v1470_v29 = vmax.f32 %v1324_v26, 0.0 }
 0x260   : > { %v1469_v28 = vmax.f32 %v1319_v27, 0.0 }
 0x262   : > { %2324 = vmatprep.mubr.msk.f32.mxu0 %vm792_vm0, %v1469_v28 }
 0x263   : > { %2325 = vmatmul.mubr.msk.f32.gmra.mrb[18].mxu0 %vm792_vm0, %v1470_v29 }
 0x264   : > { %v2265_v30 = vpop.f32.mrb[20].mxu1 }
 0x265   : > { %v1334_v31 = vadd.f32 %v2265_v30, %v2870_v49  ;;  %v1328_v32 = vpop.f32.mrb[21].mxu1 }
 0x266   : > { %v1329_v14 = vadd.f32 %v2870_v49, %v1328_v32 }
 0x267   : > { %v1472_v34 = vmax.f32 %v1334_v31, 0.0 }
 0x268   : > { %v1471_v33 = vmax.f32 %v1329_v14, 0.0 }
 0x26a   : > { %2327 = vmatprep.mubr.msk.f32.mxu0 %vm792_vm0, %v1471_v33 }
 0x26b   : > { %2328 = vmatmul.mubr.msk.f32.gmra.mrb[20].mxu0 %vm792_vm0, %v1472_v34 }
 0x26c   : > { %v2268_v48 = vpop.f32.mrb[22].mxu1 }
 0x26d   : > { %v1344_v35 = vadd.f32 %v2268_v48, %v2870_v49  ;;  %v1338_v56 = vpop.f32.mrb[23].mxu1 }
 0x26e   : > { %v1339_v36 = vadd.f32 %v2870_v49, %v1338_v56 }
 0x26f   : > { %v1474_v38 = vmax.f32 %v1344_v35, 0.0 }
 0x270   : > { %v1473_v37 = vmax.f32 %v1339_v36, 0.0 }
 0x272   : > { %2330 = vmatprep.mubr.msk.f32.mxu0 %vm792_vm0, %v1473_v37 }
 0x273   : > { %2331 = vmatmul.mubr.msk.f32.gmra.mrb[22].mxu0 %vm792_vm0, %v1474_v38 }
 0x274   : > { %v2271_v39 = vpop.f32.mrb[24].mxu1 }
 0x275   : > { %v1354_v40 = vadd.f32 %v2271_v39, %v2870_v49  ;;  %v1348_v18 = vpop.f32.mrb[25].mxu1 }
 0x276   : > { %v1349_v41 = vadd.f32 %v2870_v49, %v1348_v18 }
 0x277   : > { %v1476_v43 = vmax.f32 %v1354_v40, 0.0 }
 0x278   : > { %v1475_v42 = vmax.f32 %v1349_v41, 0.0 }
 0x27a   : > { %2333 = vmatprep.mubr.msk.f32.mxu0 %vm792_vm0, %v1475_v42 }
 0x27b   : > { %2334 = vmatmul.mubr.msk.f32.gmra.mrb[24].mxu0 %vm792_vm0, %v1476_v43 }
 0x27c   : > { %v2274_v44 = vpop.f32.mrb[26].mxu1 }
 0x27d   : > { %v1364_v45 = vadd.f32 %v2274_v44, %v2870_v49  ;;  %v1358_v46 = vpop.f32.mrb[27].mxu1 }
 0x27e   : > { %v1359_v47 = vadd.f32 %v2870_v49, %v1358_v46 }
 0x27f   : > { %v1478_v51 = vmax.f32 %v1364_v45, 0.0 }
 0x280   : > { %v1477_v50 = vmax.f32 %v1359_v47, 0.0  ;;  %v3030_v47 = vld [vmem:[%s3156_s6] ss:$0 sm:$0xff] }
 0x282   : > { %2336 = vmatprep.mubr.msk.f32.mxu0 %vm792_vm0, %v1477_v50 }
 0x283   : > { %2337 = vmatmul.mubr.msk.f32.gmra.mrb[26].mxu0 %vm792_vm0, %v1478_v51 }
 0x284   : > { %v2277_v52 = vpop.f32.mrb[28].mxu1 }
 0x285   : > { %v1374_v53 = vadd.f32 %v2277_v52, %v2870_v49  ;;  %v1368_v54 = vpop.f32.mrb[29].mxu1 }
 0x286   : > { %v1369_v55 = vadd.f32 %v2870_v49, %v1368_v54 }
 0x287   : > { %v1480_v58 = vmax.f32 %v1374_v53, 0.0 }
 0x288   : > { %v1479_v57 = vmax.f32 %v1369_v55, 0.0 }
 0x28a   : > { %2339 = vmatprep.mubr.msk.f32.mxu0 %vm792_vm0, %v1479_v57 }
 0x28b   : > { %2340 = vmatmul.mubr.msk.f32.gmra.mrb[28].mxu0 %vm792_vm0, %v1480_v58 }
 0x28c   : > { %v2280_v59 = vpop.f32.mrb[30].mxu1 }
 0x28d   : > { %v1384_v60 = vadd.f32 %v2280_v59, %v2870_v49  ;;  %v1378_v61 = vpop.f32.mrb[31].mxu1 }
 0x28e   : > { %v1379_v62 = vadd.f32 %v2870_v49, %v1378_v61 }
 0x28f   : > { %v1482_v0 = vmax.f32 %v1384_v60, 0.0 }
 0x290   : > { %v1481_v63 = vmax.f32 %v1379_v62, 0.0 }
 0x292   : > { %2342 = vmatprep.mubr.msk.f32.mxu0 %vm792_vm0, %v1481_v63 }
 0x293   : > { %2343 = vmatmul.mubr.msk.f32.gmra.mrb[30].mxu0 %vm792_vm0, %v1482_v0 }
 0x294   : > { %v2283_v1 = vpop.f32.mrb[32].mxu1 }
 0x295   : > { %v1394_v2 = vadd.f32 %v2283_v1, %v2870_v49  ;;  %v1388_v4 = vpop.f32.mrb[33].mxu1 }
 0x296   : > { %v1389_v5 = vadd.f32 %v2870_v49, %v1388_v4 }
 0x297   : > { %v1484_v7 = vmax.f32 %v1394_v2, 0.0 }
 0x298   : > { %v1483_v6 = vmax.f32 %v1389_v5, 0.0 }
 0x29a   : > { %2345 = vmatprep.mubr.msk.f32.mxu0 %vm792_vm0, %v1483_v6 }
 0x29b   : > { %2346 = vmatmul.mubr.msk.f32.gmra.mrb[32].mxu0 %vm792_vm0, %v1484_v7 }
 0x29c   : > { %v2286_v8 = vpop.f32.mrb[34].mxu1 }
 0x29d   : > { %v1404_v9 = vadd.f32 %v2286_v8, %v2870_v49  ;;  %v1398_v10 = vpop.f32.mrb[35].mxu1 }
 0x29e   : > { %v1399_v12 = vadd.f32 %v2870_v49, %v1398_v10 }
 0x29f   : > { %v1486_v15 = vmax.f32 %v1404_v9, 0.0 }
 0x2a0   : > { %v1485_v13 = vmax.f32 %v1399_v12, 0.0 }
 0x2a2   : > { %2348 = vmatprep.mubr.msk.f32.mxu0 %vm792_vm0, %v1485_v13 }
 0x2a3   : > { %2349 = vmatmul.mubr.msk.f32.gmra.mrb[34].mxu0 %vm792_vm0, %v1486_v15 }
 0x2a4   : > { %v2289_v16 = vpop.f32.mrb[36].mxu1 }
 0x2a5   : > { %v1414_v17 = vadd.f32 %v2289_v16, %v2870_v49  ;;  %v1408_v19 = vpop.f32.mrb[37].mxu1 }
 0x2a6   : > { %v1409_v20 = vadd.f32 %v2870_v49, %v1408_v19 }
 0x2a7   : > { %v1488_v21 = vmax.f32 %v1414_v17, 0.0 }
 0x2a8   : > { %v1487_v3 = vmax.f32 %v1409_v20, 0.0 }
 0x2aa   : > { %2351 = vmatprep.mubr.msk.f32.mxu0 %vm792_vm0, %v1487_v3 }
 0x2ab   : > { %2352 = vmatmul.mubr.msk.f32.gmra.mrb[36].mxu0 %vm792_vm0, %v1488_v21 }
 0x2ac   : > { %v2292_v22 = vpop.f32.mrb[38].mxu1 }
 0x2ad   : > { %v1424_v23 = vadd.f32 %v2292_v22, %v2870_v49  ;;  %v1418_v24 = vpop.f32.mrb[39].mxu1 }
 0x2ae   : > { %v1419_v25 = vadd.f32 %v2870_v49, %v1418_v24 }
 0x2af   : > { %v1490_v11 = vmax.f32 %v1424_v23, 0.0 }
 0x2b0   : > { %v1489_v26 = vmax.f32 %v1419_v25, 0.0 }
 0x2b2   : > { %2354 = vmatprep.mubr.msk.f32.mxu0 %vm792_vm0, %v1489_v26 }
 0x2b3   : > { %2355 = vmatmul.mubr.msk.f32.gmra.mrb[38].mxu0 %vm792_vm0, %v1490_v11 }
 0x2b4   : > { %v2295_v27 = vpop.f32.mrb[40].mxu1 }
 0x2b5   : > { %v1434_v28 = vadd.f32 %v2295_v27, %v2870_v49  ;;  %v1428_v29 = vpop.f32.mrb[41].mxu1 }
 0x2b6   : > { %v1429_v30 = vadd.f32 %v2870_v49, %v1428_v29 }
 0x2b7   : > { %v1492_v32 = vmax.f32 %v1434_v28, 0.0 }
 0x2b8   : > { %v1491_v31 = vmax.f32 %v1429_v30, 0.0 }
 0x2ba   : > { %2357 = vmatprep.mubr.msk.f32.mxu0 %vm792_vm0, %v1491_v31 }
 0x2bb   : > { %2358 = vmatmul.mubr.msk.f32.gmra.mrb[40].mxu0 %vm792_vm0, %v1492_v32 }
 0x2bc   : > { %v2298_v14 = vpop.f32.mrb[42].mxu1 }
 0x2bd   : > { %v1444_v33 = vadd.f32 %v2298_v14, %v2870_v49  ;;  %v1438_v34 = vpop.f32.mrb[43].mxu1 }
 0x2be   : > { %v1439_v48 = vadd.f32 %v2870_v49, %v1438_v34 }
 0x2bf   : > { %v1494_v56 = vmax.f32 %v1444_v33, 0.0 }
 0x2c0   : > { %v1493_v35 = vmax.f32 %v1439_v48, 0.0 }
 0x2c2   : > { %2360 = vmatprep.mubr.msk.f32.mxu0 %vm792_vm0, %v1493_v35 }
 0x2c3   : > { %2361 = vmatmul.mubr.msk.f32.gmra.mrb[42].mxu0 %vm792_vm0, %v1494_v56 }
 0x2c4   : > { %v2301_v36 = vpop.f32.mrb[44].mxu1 }
 0x2c5   : > { %v1454_v37 = vadd.f32 %v2301_v36, %v2870_v49  ;;  %v1448_v38 = vpop.f32.mrb[45].mxu1 }
 0x2c6   : > { %v1449_v39 = vadd.f32 %v2870_v49, %v1448_v38 }
 0x2c7   : > { %v1496_v18 = vmax.f32 %v1454_v37, 0.0 }
 0x2c8   : > { %v1495_v40 = vmax.f32 %v1449_v39, 0.0 }
 0x2ca   : > { %2363 = vmatprep.mubr.msk.f32.mxu0 %vm792_vm0, %v1495_v40 }
 0x2cb   : > { %2364 = vmatmul.mubr.msk.f32.gmra.mrb[44].mxu0 %vm792_vm0, %v1496_v18 }
 0x2cc   : > { %v2304_v41 = vpop.f32.mrb[46].mxu1 }
 0x2cd   : > { %v1464_v42 = vadd.f32 %v2304_v41, %v2870_v49  ;;  %v1458_v43 = vpop.f32.mrb[47].mxu1 }
 0x2ce   : > { %v1459_v44 = vadd.f32 %v2870_v49, %v1458_v43 }
 0x2cf   : > { %v1498_v46 = vmax.f32 %v1464_v42, 0.0 }
 0x2d0   : > { %v1497_v45 = vmax.f32 %v1459_v44, 0.0 }
 0x2d2   : > { %2366 = vmatprep.mubr.msk.f32.mxu0 %vm792_vm0, %v1497_v45 }
 0x2d3   : > { %2367 = vmatmul.mubr.msk.f32.gmra.mrb[46].mxu0 %vm792_vm0, %v1498_v46 }
 0x32e   : > { %v2323_v50 = vpop.f32.mrb[16].mxu0 }
 0x32f   : > { %v1682_v51 = vadd.f32 %v2323_v50, %v3030_v47  ;;  %v1676_v52 = vpop.f32.mrb[17].mxu0 }
 0x330   : > { %v1677_v49 = vadd.f32 %v3030_v47, %v1676_v52 }
 0x331   : > { %1836 = vst [vmem:[%s3034_s20 + $0x8] sm:$0xff] %v1682_v51 }
 0x332   : > { %1835 = vst [vmem:[%s3034_s20] sm:$0xff] %v1677_v49 }
 0x336   : > { %v2326_v53 = vpop.f32.mrb[18].mxu0 }
 0x337   : > { %v1692_v54 = vadd.f32 %v2326_v53, %v3030_v47  ;;  %v1686_v55 = vpop.f32.mrb[19].mxu0 }
 0x338   : > { %v1687_v57 = vadd.f32 %v3030_v47, %v1686_v55 }
 0x339   : > { %1838 = vst [vmem:[%s3034_s20 + $0x18] sm:$0xff] %v1692_v54 }
 0x33a   : > { %1837 = vst [vmem:[%s3034_s20 + $0x10] sm:$0xff] %v1687_v57 }
 0x33e   : > { %v2329_v58 = vpop.f32.mrb[20].mxu0 }
 0x33f   : > { %v1702_v59 = vadd.f32 %v2329_v58, %v3030_v47  ;;  %v1696_v60 = vpop.f32.mrb[21].mxu0 }
 0x340   : > { %v1697_v61 = vadd.f32 %v3030_v47, %v1696_v60 }
 0x341   : > { %1840 = vst [vmem:[%s3034_s20 + $0x28] sm:$0xff] %v1702_v59 }
 0x342   : > { %1839 = vst [vmem:[%s3034_s20 + $0x20] sm:$0xff] %v1697_v61 }
 0x346   : > { %v2332_v62 = vpop.f32.mrb[22].mxu0 }
 0x347   : > { %v1712_v63 = vadd.f32 %v2332_v62, %v3030_v47  ;;  %v1706_v0 = vpop.f32.mrb[23].mxu0 }
 0x348   : > { %v1707_v1 = vadd.f32 %v3030_v47, %v1706_v0 }
 0x349   : > { %1842 = vst [vmem:[%s3034_s20 + $0x38] sm:$0xff] %v1712_v63 }
 0x34a   : > { %1841 = vst [vmem:[%s3034_s20 + $0x30] sm:$0xff] %v1707_v1 }
 0x34e   : > { %v2335_v2 = vpop.f32.mrb[24].mxu0 }
 0x34f   : > { %v1722_v4 = vadd.f32 %v2335_v2, %v3030_v47  ;;  %v1716_v5 = vpop.f32.mrb[25].mxu0 }
 0x350   : > { %v1717_v6 = vadd.f32 %v3030_v47, %v1716_v5 }
 0x351   : > { %1844 = vst [vmem:[%s3034_s20 + $0x48] sm:$0xff] %v1722_v4 }
 0x352   : > { %1843 = vst [vmem:[%s3034_s20 + $0x40] sm:$0xff] %v1717_v6 }
 0x356   : > { %v2338_v7 = vpop.f32.mrb[26].mxu0 }
 0x357   : > { %v1732_v8 = vadd.f32 %v2338_v7, %v3030_v47  ;;  %v1726_v9 = vpop.f32.mrb[27].mxu0 }
 0x358   : > { %v1727_v10 = vadd.f32 %v3030_v47, %v1726_v9 }
 0x359   : > { %1846 = vst [vmem:[%s3034_s20 + $0x58] sm:$0xff] %v1732_v8 }
 0x35a   : > { %1845 = vst [vmem:[%s3034_s20 + $0x50] sm:$0xff] %v1727_v10 }
 0x35e   : > { %v2341_v12 = vpop.f32.mrb[28].mxu0 }
 0x35f   : > { %v1742_v13 = vadd.f32 %v2341_v12, %v3030_v47  ;;  %v1736_v15 = vpop.f32.mrb[29].mxu0 }
 0x360   : > { %v1737_v16 = vadd.f32 %v3030_v47, %v1736_v15 }
 0x361   : > { %1848 = vst [vmem:[%s3034_s20 + $0x68] sm:$0xff] %v1742_v13 }
 0x362   : > { %1847 = vst [vmem:[%s3034_s20 + $0x60] sm:$0xff] %v1737_v16 }
 0x366   : > { %v2344_v17 = vpop.f32.mrb[30].mxu0 }
 0x367   : > { %v1752_v19 = vadd.f32 %v2344_v17, %v3030_v47  ;;  %v1746_v20 = vpop.f32.mrb[31].mxu0 }
 0x368   : > { %v1747_v3 = vadd.f32 %v3030_v47, %v1746_v20 }
 0x369   : > { %1850 = vst [vmem:[%s3034_s20 + $0x78] sm:$0xff] %v1752_v19 }
 0x36a   : > { %1849 = vst [vmem:[%s3034_s20 + $0x70] sm:$0xff] %v1747_v3 }
 0x36e   : > { %v2347_v21 = vpop.f32.mrb[32].mxu0 }
 0x36f   : > { %v1762_v22 = vadd.f32 %v2347_v21, %v3030_v47  ;;  %v1756_v23 = vpop.f32.mrb[33].mxu0 }
 0x370   : > { %v1757_v24 = vadd.f32 %v3030_v47, %v1756_v23 }
 0x371   : > { %1852 = vst [vmem:[%s3034_s20 + $0x88] sm:$0xff] %v1762_v22 }
 0x372   : > { %1851 = vst [vmem:[%s3034_s20 + $0x80] sm:$0xff] %v1757_v24 }
 0x376   : > { %v2350_v25 = vpop.f32.mrb[34].mxu0 }
 0x377   : > { %v1772_v26 = vadd.f32 %v2350_v25, %v3030_v47  ;;  %v1766_v11 = vpop.f32.mrb[35].mxu0 }
 0x378   : > { %v1767_v27 = vadd.f32 %v3030_v47, %v1766_v11 }
 0x379   : > { %1854 = vst [vmem:[%s3034_s20 + $0x98] sm:$0xff] %v1772_v26 }
 0x37a   : > { %1853 = vst [vmem:[%s3034_s20 + $0x90] sm:$0xff] %v1767_v27 }
 0x37e   : > { %v2353_v28 = vpop.f32.mrb[36].mxu0 }
 0x37f   : > { %v1782_v29 = vadd.f32 %v2353_v28, %v3030_v47  ;;  %v1776_v30 = vpop.f32.mrb[37].mxu0 }
 0x380   : > { %v1777_v31 = vadd.f32 %v3030_v47, %v1776_v30 }
 0x381   : > { %1856 = vst [vmem:[%s3034_s20 + $0xa8] sm:$0xff] %v1782_v29 }
 0x382   : > { %1855 = vst [vmem:[%s3034_s20 + $0xa0] sm:$0xff] %v1777_v31 }
 0x386   : > { %v2356_v32 = vpop.f32.mrb[38].mxu0 }
 0x387   : > { %v1792_v14 = vadd.f32 %v2356_v32, %v3030_v47  ;;  %v1786_v33 = vpop.f32.mrb[39].mxu0 }
 0x388   : > { %v1787_v34 = vadd.f32 %v3030_v47, %v1786_v33 }
 0x389   : > { %1858 = vst [vmem:[%s3034_s20 + $0xb8] sm:$0xff] %v1792_v14 }
 0x38a   : > { %1857 = vst [vmem:[%s3034_s20 + $0xb0] sm:$0xff] %v1787_v34 }
 0x38e   : > { %v2359_v48 = vpop.f32.mrb[40].mxu0 }
 0x38f   : > { %v1802_v35 = vadd.f32 %v2359_v48, %v3030_v47  ;;  %v1796_v56 = vpop.f32.mrb[41].mxu0 }
 0x390   : > { %v1797_v36 = vadd.f32 %v3030_v47, %v1796_v56 }
 0x391   : > { %1860 = vst [vmem:[%s3034_s20 + $0xc8] sm:$0xff] %v1802_v35 }
 0x392   : > { %1859 = vst [vmem:[%s3034_s20 + $0xc0] sm:$0xff] %v1797_v36 }
 0x396   : > { %v2362_v37 = vpop.f32.mrb[42].mxu0 }
 0x397   : > { %v1812_v38 = vadd.f32 %v2362_v37, %v3030_v47  ;;  %v1806_v39 = vpop.f32.mrb[43].mxu0 }
 0x398   : > { %v1807_v40 = vadd.f32 %v3030_v47, %v1806_v39 }
 0x399   : > { %1862 = vst [vmem:[%s3034_s20 + $0xd8] sm:$0xff] %v1812_v38 }
 0x39a   : > { %1861 = vst [vmem:[%s3034_s20 + $0xd0] sm:$0xff] %v1807_v40 }
 0x39e   : > { %v2365_v18 = vpop.f32.mrb[44].mxu0 }
 0x39f   : > { %v1822_v41 = vadd.f32 %v2365_v18, %v3030_v47  ;;  %v1816_v42 = vpop.f32.mrb[45].mxu0 }
 0x3a0   : > { %v1817_v43 = vadd.f32 %v3030_v47, %v1816_v42 }
 0x3a1   : > { %1864 = vst [vmem:[%s3034_s20 + $0xe8] sm:$0xff] %v1822_v41 }
 0x3a2   : > { %1863 = vst [vmem:[%s3034_s20 + $0xe0] sm:$0xff] %v1817_v43 }
 0x3a6   : > { %v2368_v44 = vpop.f32.mrb[46].mxu0 }
 0x3a7   : > { %v1832_v45 = vadd.f32 %v2368_v44, %v3030_v47  ;;  %v1826_v46 = vpop.f32.mrb[47].mxu0 }
 0x3a8   : > { %v1827_v50 = vadd.f32 %v3030_v47, %v1826_v46 }
 0x3a9   : > { %1866 = vst [vmem:[%s3034_s20 + $0xf8] sm:$0xff] %v1832_v45 }
 0x3aa   : > { %1865 = vst [vmem:[%s3034_s20 + $0xf0] sm:$0xff] %v1827_v50 }
 0x3ab   : > { %2486 = shalt.err (!%p2483_p3)
}
 0x3ac   : > { %s2487_s16 = scalar_lea.hbm %s3100_s8, 4096  ;;  %s2491_s19 = scalar_lea.hbm %s3157_s7, 8192 }
 0x3ad   : > { %p2488_p4 = scmp.ne.s32.totalorder %s3100_s8, %s2487_s16  ;;  %p2492_p9 = scmp.lt.u32.totalorder %s3100_s8, %s3157_s7 }
 0x3ae   : > { %p2493_p10 = scmp.lt.u32.totalorder %s2491_s19, %s2487_s16  ;;  %p2495_p12 = scmp.lt.u32.totalorder %s2487_s16, %s3100_s8 }
 0x3af   : > { %p2489_p7 = pnand %p2488_p4, %p2620_p5 }
 0x3b0   : > { %p2494_p11 = por %p2493_p10, %p2492_p9 }
 0x3b1   : > { %p2490_p8 = pneg %p2489_p7 }
 0x3b2   : > { %p2496_p13 = por %p2495_p12, %p2494_p11 }
 0x3b4   : > { %p2497_p0 = pnand %p2496_p13, %p2490_p8 }
 0x3b6   : > { %2500 = shalt.err (!%p2497_p0)
}
 0x3b7   : > { %s2540_s29 = smov 128   ;;  %s2541_s21 = smov 8  }
 0x3b8   : > { %2425 = dma.vmem_to_hbm [thread:$0]  (%p2620_p5), %s3102_s23, 4096, %s3100_s8, %s3109_s28, %s2540_s29, %s2540_s29, %s2541_s21  }
 0x3b9 PF: > { %p2431_p1 = scmp.ge.s32.totalorder %s2535_s27, 2  ;;  %s1896_s9 = sand.u32 1, %s2523_s24  }
 0x3ba   : > { %s1897_s13 = scalar_lea.sflag [#allocation3], %s1896_s9 }
 0x3bb   : > { %p2428_p2 = pnand %p2431_p1, %p2624_p6 }
 0x3bd   : > { %2518 = dma.done.wait (!%p2428_p2), %s1897_s13, 4096  }
 0x3be   : > { %2520 = vsyncadd (!%p2428_p2), %s1897_s13, 4294963200  ;;  %p17_p3 = scmp.ge.s32.totalorder %s2607_s30, 4   ;;  %s3160_s24 = smov %s2527_s25 }
 0x3bf   : > { %s3161_s25 = smov %s2531_s26  ;;  %s3162_s26 = smov %s2618_s10 }
 0x3c0   : > { %s3163_s27 = smov %s2607_s30  ;;  %19 = sbr.rel (!%p17_p3) target bundleno = 3 (0x3), region = 83 }
 0x3c7   :  { %1902 = vsyncpa [#allocation3], 1 }
 0x3c8   :  { %1904 = vsyncpa [#allocation3 + $0x1], 1 }

</bundles_post_ra>
